<compile_context>
chip_gen: v7x
topology: tpu7x:2x2x1
jax: 0.10.0
libtpu: 0.0.40
codegen_flags: <defaults>
</compile_context>

<pallas_src>
import jax
import jax.numpy as jnp
from jax import lax
from jax.experimental import pallas as pl
from jax.experimental.pallas import tpu as pltpu


def _scene_disc_kernel(x1_ref, x2_ref, w1at_ref, w1bt_ref, w2t_ref, p_ref, o_ref):
    # x?_ref  : (TB, pose_dim) bf16   -- native layout, batch on sublanes
    # w1at/bt : (hidden, pose_dim) bf16 (w1 split along K = the fused concat)
    # w2t     : (hidden, hidden) bf16
    # p_ref   : (hidden, 4) f32 packed columns [b1 | b2 | w3 | b3(bcast)]
    # o_ref   : (1, TB) f32           -- lane-dense output slab
    p = p_ref[...]
    b1 = p[:, 0:1]
    b2 = p[:, 1:2]
    w3 = p[:, 2:3]
    b3 = p[0:1, 3:4]

    contract_last = (((1,), (1,)), ((), ()))  # contract pose_dim on both sides

    # Layer 1: split-K matmul fuses torch.cat(x, 1) @ W1; result is (hidden, TB).
    h1 = (lax.dot_general(w1at_ref[...], x1_ref[...], contract_last,
                          preferred_element_type=jnp.float32)
          + lax.dot_general(w1bt_ref[...], x2_ref[...], contract_last,
                            preferred_element_type=jnp.float32)
          + b1)
    h1 = jnp.maximum(h1, 0.0)                               # ReLU (f32 VPU)

    # Layer 2.
    h2 = (jnp.dot(w2t_ref[...], h1.astype(jnp.bfloat16),
                  preferred_element_type=jnp.float32)
          + b2)                                             # (hidden, TB)
    h2 = jnp.maximum(h2, 0.0)                               # ReLU

    # Layer 3: 1-wide output -> VPU multiply + sublane reduce (no 1-col matmul).
    logit = jnp.sum(h2 * w3, axis=0, keepdims=True) + b3    # (1, TB)
    o_ref[...] = jax.nn.sigmoid(logit).astype(o_ref.dtype)  # lane-dense store


def _round_up(n, m):
    return ((n + m - 1) // m) * m


def scene_discriminator_forward(x_list, params, pose_dim, *, tb=512):
    """x_list: list of pose tensors (B, pose_dim). Returns sigmoid logits (B, 1)."""
    w1, b1, w2, b2, w3, b3 = params
    hidden = w1.shape[1]

    # Fast path (standard use: two pose tensors) keeps the concat fused in the
    # kernel; the generic path reproduces torch.cat(x,1).view(-1, 2*pose_dim).
    if len(x_list) == 2 and all(t.shape[-1] == pose_dim for t in x_list):
        x1, x2 = x_list
    else:
        xin = jnp.concatenate(x_list, axis=1).reshape(-1, 2 * pose_dim)
        x1, x2 = xin[:, :pose_dim], xin[:, pose_dim:]

    B = x1.shape[0]
    # Batch tile: multiple of 256 (256-wide v6e/v7x MXU lanes), capped at `tb`,
    # adaptively shrunk for tiny batches.
    tb_eff = _round_up(max(256, min(tb, _round_up(B, 256))), 256)
    b_pad = _round_up(B, tb_eff)
    n_tiles = b_pad // tb_eff

    # Wrapper plumbing: pad batch rows (only if needed) and cast to bf16 to
    # halve the dominant input DMA bytes. No transposes of the inputs.
    def prep(x):
        if b_pad != B:
            x = jnp.pad(x, ((0, b_pad - B), (0, 0)))
        return x.astype(jnp.bfloat16)

    x1p, x2p = prep(x1), prep(x2)

    # Pre-transposed / bf16 weights (tiny, one-time) + packed f32 param slab.
    w1at = w1[:pose_dim, :].T.astype(jnp.bfloat16)          # (hidden, pose_dim)
    w1bt = w1[pose_dim:, :].T.astype(jnp.bfloat16)          # (hidden, pose_dim)
    w2t = w2.T.astype(jnp.bfloat16)                         # (hidden, hidden)
    pvec = jnp.concatenate(
        [b1.reshape(hidden, 1),
         b2.reshape(hidden, 1),
         w3.reshape(hidden, 1),
         jnp.broadcast_to(b3.reshape(1, 1), (hidden, 1))],
        axis=1).astype(jnp.float32)                         # (hidden, 4)

    flops = 2 * b_pad * (2 * pose_dim * hidden + hidden * hidden + hidden)
    bytes_accessed = (2 * b_pad * pose_dim * 2                 # bf16 inputs
                      + (2 * pose_dim * hidden + hidden * hidden) * 2  # weights
                      + hidden * 4 * 4                         # packed params
                      + b_pad * 4)                             # f32 output

    out = pl.pallas_call(
        _scene_disc_kernel,
        out_shape=jax.ShapeDtypeStruct((1, b_pad), jnp.float32),
        grid=(n_tiles,),
        in_specs=[
            pl.BlockSpec((tb_eff, pose_dim), lambda i: (i, 0)),    # x1 tile
            pl.BlockSpec((tb_eff, pose_dim), lambda i: (i, 0)),    # x2 tile
            pl.BlockSpec((hidden, pose_dim), lambda i: (0, 0)),    # w1[:pose_dim].T
            pl.BlockSpec((hidden, pose_dim), lambda i: (0, 0)),    # w1[pose_dim:].T
            pl.BlockSpec((hidden, hidden), lambda i: (0, 0)),      # w2.T
            pl.BlockSpec((hidden, 4), lambda i: (0, 0)),           # [b1|b2|w3|b3]
        ],
        out_specs=pl.BlockSpec((1, tb_eff), lambda i: (0, i)),
        compiler_params=pltpu.CompilerParams(
            dimension_semantics=("parallel",)),
        cost_estimate=pl.CostEstimate(
            flops=flops, transcendentals=b_pad, bytes_accessed=bytes_accessed),
    )(x1p, x2p, w1at, w1bt, w2t, pvec)

    # Lane-dense (1, b_pad) slab -> (B, 1) like the PyTorch module.  Padded
    # lanes hold sigmoid(bias-only) garbage and must never be consumed.
    return out[0, :B].reshape(B, 1)


def init_params(key, pose_dim, hidden):
    """Deterministic init mirroring nn.Linear default (uniform +/- 1/sqrt(fan_in))."""
    in_dim = pose_dim * 2
    ks = jax.random.split(key, 6)

    def lin(kw, kb, fan_in, fan_out):
        bound = 1.0 / jnp.sqrt(fan_in)
        w = jax.random.uniform(kw, (fan_in, fan_out), jnp.float32, -bound, bound)
        b = jax.random.uniform(kb, (1, fan_out), jnp.float32, -bound, bound)
        return w, b

    w1, b1 = lin(ks[0], ks[1], in_dim, hidden)
    w2, b2 = lin(ks[2], ks[3], hidden, hidden)
    w3, b3 = lin(ks[4], ks[5], hidden, 1)
    return (w1, b1, w2, b2, w3, b3)


if __name__ == "__main__":
    # Module-consistent shapes: pose_dim=16, hidden=32.  batch=600 stands in for
    # several discriminator invocations folded into one call; with the default
    # tb=512 it exercises lane padding (600 -> 1024) and a 2-step "parallel"
    # grid (megacore path on v7x).
    pose_dim = 16
    hidden = 32
    batch = 600

    key = jax.random.PRNGKey(0)
    kx1, kx2, kp = jax.random.split(key, 3)
    x1 = jax.random.normal(kx1, (batch, pose_dim), jnp.float32)
    x2 = jax.random.normal(kx2, (batch, pose_dim), jnp.float32)
    params = init_params(kp, pose_dim, hidden)

    out = scene_discriminator_forward([x1, x2], params, pose_dim)
    out = jax.block_until_ready(out)

    # Pure-JAX f32 reference (same math). Tolerance loosened for bf16 MXU matmuls.
    w1, b1, w2, b2, w3, b3 = params
    xin = jnp.concatenate([x1, x2], axis=1).reshape(-1, pose_dim * 2)
    h1 = jnp.maximum(xin @ w1 + b1, 0.0)
    h2 = jnp.maximum(h1 @ w2 + b2, 0.0)
    ref = jax.nn.sigmoid(h2 @ w3 + b3)

    assert out.shape == (batch, 1)
    assert jnp.allclose(out, ref, atol=2e-2), "mismatch vs reference"

    print("KERNEL_OK")
</pallas_src>

<mosaic_0001>
module attributes {stable_mosaic.version = 11 : i64} {
  func.func @_scene_disc_kernel(%arg0: i32, %arg1: memref<512x16xbf16, #tpu.memory_space<vmem>>, %arg2: memref<512x16xbf16, #tpu.memory_space<vmem>>, %arg3: memref<32x16xbf16, #tpu.memory_space<vmem>>, %arg4: memref<32x16xbf16, #tpu.memory_space<vmem>>, %arg5: memref<32x32xbf16, #tpu.memory_space<vmem>>, %arg6: memref<32x4xf32, #tpu.memory_space<vmem>>, %arg7: memref<1x512xf32, #tpu.memory_space<vmem>>) attributes {dimension_semantics = [#tpu.dimension_semantics<parallel>], iteration_bounds = array<i64: 2>, scalar_prefetch = 0 : i64, scratch_operands = 0 : i64, tpu.core_type = #tpu.core_type<tc>, window_params = [{transform_indices = @transform_0, window_bounds = array<i64: 512, 16>}, {transform_indices = @transform_1, window_bounds = array<i64: 512, 16>}, {pipeline_mode = #tpu.pipeline_mode<synchronous>, transform_indices = @transform_2, window_bounds = array<i64: 32, 16>}, {pipeline_mode = #tpu.pipeline_mode<synchronous>, transform_indices = @transform_3, window_bounds = array<i64: 32, 16>}, {pipeline_mode = #tpu.pipeline_mode<synchronous>, transform_indices = @transform_4, window_bounds = array<i64: 32, 32>}, {pipeline_mode = #tpu.pipeline_mode<synchronous>, transform_indices = @transform_5, window_bounds = array<i64: 32, 4>}, {transform_indices = @transform_6, window_bounds = array<i64: 1, 512>}]} {
    %c0 = arith.constant 0 : index
    %c0_0 = arith.constant 0 : index
    %0 = vector.load %arg6[%c0, %c0_0] : memref<32x4xf32, #tpu.memory_space<vmem>>, vector<32x4xf32>
    %1 = vector.extract_strided_slice %0 {offsets = [0, 0], sizes = [32, 1], strides = [1, 1]} : vector<32x4xf32> to vector<32x1xf32>
    %2 = vector.extract_strided_slice %0 {offsets = [0, 1], sizes = [32, 1], strides = [1, 1]} : vector<32x4xf32> to vector<32x1xf32>
    %3 = vector.extract_strided_slice %0 {offsets = [0, 2], sizes = [32, 1], strides = [1, 1]} : vector<32x4xf32> to vector<32x1xf32>
    %4 = vector.extract_strided_slice %0 {offsets = [0, 3], sizes = [1, 1], strides = [1, 1]} : vector<32x4xf32> to vector<1x1xf32>
    %c0_1 = arith.constant 0 : index
    %c0_2 = arith.constant 0 : index
    %5 = vector.load %arg3[%c0_1, %c0_2] : memref<32x16xbf16, #tpu.memory_space<vmem>>, vector<32x16xbf16>
    %c0_3 = arith.constant 0 : index
    %c0_4 = arith.constant 0 : index
    %6 = vector.load %arg1[%c0_3, %c0_4] : memref<512x16xbf16, #tpu.memory_space<vmem>>, vector<512x16xbf16>
    %cst = arith.constant dense<0.000000e+00> : vector<32x512xf32>
    %7 = tpu.matmul %5, %6, %cst {dimension_numbers = #tpu.dot_dimension_numbers<[1], [1], [0], [0], [0, 0, 1, 0], [], []>} : vector<32x16xbf16>, vector<512x16xbf16>, vector<32x512xf32> -> vector<32x512xf32>
    %c0_5 = arith.constant 0 : index
    %c0_6 = arith.constant 0 : index
    %8 = vector.load %arg4[%c0_5, %c0_6] : memref<32x16xbf16, #tpu.memory_space<vmem>>, vector<32x16xbf16>
    %c0_7 = arith.constant 0 : index
    %c0_8 = arith.constant 0 : index
    %9 = vector.load %arg2[%c0_7, %c0_8] : memref<512x16xbf16, #tpu.memory_space<vmem>>, vector<512x16xbf16>
    %cst_9 = arith.constant dense<0.000000e+00> : vector<32x512xf32>
    %10 = tpu.matmul %8, %9, %cst_9 {dimension_numbers = #tpu.dot_dimension_numbers<[1], [1], [0], [0], [0, 0, 1, 0], [], []>} : vector<32x16xbf16>, vector<512x16xbf16>, vector<32x512xf32> -> vector<32x512xf32>
    %11 = arith.addf %7, %10 : vector<32x512xf32>
    %12 = vector.broadcast %1 : vector<32x1xf32> to vector<32x512xf32>
    %13 = arith.addf %11, %12 : vector<32x512xf32>
    %cst_10 = arith.constant 0.000000e+00 : f32
    %14 = vector.broadcast %cst_10 : f32 to vector<32x512xf32>
    %15 = arith.maximumf %13, %14 : vector<32x512xf32>
    %c0_11 = arith.constant 0 : index
    %c0_12 = arith.constant 0 : index
    %16 = vector.load %arg5[%c0_11, %c0_12] : memref<32x32xbf16, #tpu.memory_space<vmem>>, vector<32x32xbf16>
    %17 = arith.truncf %15 : vector<32x512xf32> to vector<32x512xbf16>
    %cst_13 = arith.constant dense<0.000000e+00> : vector<32x512xf32>
    %18 = tpu.matmul %16, %17, %cst_13 {dimension_numbers = #tpu.dot_dimension_numbers<[1], [0], [0], [1], [0, 0, 1, 1], [], []>} : vector<32x32xbf16>, vector<32x512xbf16>, vector<32x512xf32> -> vector<32x512xf32>
    %19 = vector.broadcast %2 : vector<32x1xf32> to vector<32x512xf32>
    %20 = arith.addf %18, %19 : vector<32x512xf32>
    %cst_14 = arith.constant 0.000000e+00 : f32
    %21 = vector.broadcast %cst_14 : f32 to vector<32x512xf32>
    %22 = arith.maximumf %20, %21 : vector<32x512xf32>
    %23 = vector.broadcast %3 : vector<32x1xf32> to vector<32x512xf32>
    %24 = arith.mulf %22, %23 : vector<32x512xf32>
    %cst_15 = arith.constant dense<0.000000e+00> : vector<512xf32>
    %25 = vector.multi_reduction <add>, %24, %cst_15 [0] : vector<32x512xf32> to vector<512xf32>
    %26 = vector.shape_cast %25 : vector<512xf32> to vector<1x512xf32>
    %27 = vector.broadcast %4 : vector<1x1xf32> to vector<1x512xf32>
    %28 = arith.addf %26, %27 : vector<1x512xf32>
    %29 = arith.negf %28 : vector<1x512xf32>
    %30 = math.exp %29 : vector<1x512xf32>
    %cst_16 = arith.constant 1.000000e+00 : f32
    %31 = vector.broadcast %cst_16 : f32 to vector<1x512xf32>
    %32 = arith.addf %31, %30 : vector<1x512xf32>
    %33 = arith.divf %31, %32 : vector<1x512xf32>
    %c0_17 = arith.constant 0 : index
    %c0_18 = arith.constant 0 : index
    %34 = vector.load %arg7[%c0_17, %c0_18] : memref<1x512xf32, #tpu.memory_space<vmem>>, vector<1x512xf32>
    tpu.vector_store %arg7[%c0_17, %c0_18], %33 {strides = array<i32>} : memref<1x512xf32, #tpu.memory_space<vmem>>, vector<1x512xf32>,
    return
  }
  func.func @transform_0(%arg0: i32) -> (i32, i32) {
    %c0_i32 = arith.constant 0 : i32
    %c0_i32_0 = arith.constant 0 : i32
    return %arg0, %c0_i32 : i32, i32
  }
  func.func @transform_1(%arg0: i32) -> (i32, i32) {
    %c0_i32 = arith.constant 0 : i32
    %c0_i32_0 = arith.constant 0 : i32
    return %arg0, %c0_i32 : i32, i32
  }
  func.func @transform_2(%arg0: i32) -> (i32, i32) {
    %c0_i32 = arith.constant 0 : i32
    %c0_i32_0 = arith.constant 0 : i32
    %c0_i32_1 = arith.constant 0 : i32
    return %c0_i32, %c0_i32_0 : i32, i32
  }
  func.func @transform_3(%arg0: i32) -> (i32, i32) {
    %c0_i32 = arith.constant 0 : i32
    %c0_i32_0 = arith.constant 0 : i32
    %c0_i32_1 = arith.constant 0 : i32
    return %c0_i32, %c0_i32_0 : i32, i32
  }
  func.func @transform_4(%arg0: i32) -> (i32, i32) {
    %c0_i32 = arith.constant 0 : i32
    %c0_i32_0 = arith.constant 0 : i32
    %c0_i32_1 = arith.constant 0 : i32
    return %c0_i32, %c0_i32_0 : i32, i32
  }
  func.func @transform_5(%arg0: i32) -> (i32, i32) {
    %c0_i32 = arith.constant 0 : i32
    %c0_i32_0 = arith.constant 0 : i32
    %c0_i32_1 = arith.constant 0 : i32
    return %c0_i32, %c0_i32_0 : i32, i32
  }
  func.func @transform_6(%arg0: i32) -> (i32, i32) {
    %c0_i32 = arith.constant 0 : i32
    %c0_i32_0 = arith.constant 0 : i32
    return %c0_i32, %arg0 : i32, i32
  }
}

</mosaic_0001>

<bundles_post_ra>
// kernel: tpu_custom_call.1
= control target key start
LH: loop header
LB: loop body
LE: loop exit
PB: predicated region body
PF: predicated region fallthrough
CT: control target
= control target key end

     0   :  { %11 = vsyncpa [#allocation3], 0  ;;  %s2409_s0 = inlined_call_operand.vmem [shape: bf16[1024,16], index: 0, kind: input, shape index: {}]   ;;  %s2410_s1 = inlined_call_operand.vmem [shape: bf16[1024,16], index: 1, kind: input, shape index: {}]   ;;  %s2411_s2 = inlined_call_operand.vmem [shape: bf16[32,16], index: 2, kind: input, shape index: {}]   ;;  %s2412_s3 = inlined_call_operand.vmem [shape: bf16[32,16], index: 3, kind: input, shape index: {}]   ;;  %s2413_s4 = inlined_call_operand.vmem [shape: bf16[32,32], index: 4, kind: input, shape index: {}]   ;;  %s2414_s5 = inlined_call_operand.vmem [shape: f32[32,4], index: 5, kind: input, shape index: {}]   ;;  %s2415_s6 = inlined_call_operand.hbm [shape: f32[1,1024], index: 6, kind: output, shape index: {}]  }
   0x1   :  { %13 = vsyncpa [#allocation3 + $0x1], 0  ;;  %s2083_s21 = smov 0   ;;  %s2085_s22 = smov 0  }
   0x2   :  { %s2087_s23 = smov 0   ;;  %s2089_s24 = smov 0  }
   0x3 LB: > { %s1611_s25 = sadd.s32 4294967295, %s2040_s24   ;;  %s1612_s26 = sadd.s32 4294967294, %s2040_s24   ;;  %s2040_s24 = sphi %s2089_s24, %s2421_s24   ;;  %s2036_s23 = sphi %s2087_s23, %s2420_s23   ;;  %s2032_s22 = sphi %s2085_s22, %s2419_s22   ;;  %s2028_s21 = sphi %s2083_s21, %s2418_s21  }
   0x4   : > { %s2106_s27 = sadd.s32 1, %s2040_s24   ;;  %s162_s28 = sadd.s32 1, %s2036_s23 }
   0x5   : > { %s159_s29 = ssub.s32 %s2040_s24, %s2106_s27  ;;  %p172_p0 = scmp.ne.s32.totalorder %s2036_s23, %s2032_s22 }
   0x6   : > { %p160_p1 = scmp.eq.s32.totalorder %s159_s29, 0  ;;  %p173_p2 = scmp.eq.s32.totalorder %s1611_s25, 1 }
   0x7   : > { %p178_p3 = scmp.ne.s32.totalorder %s2032_s22, %s2028_s21  ;;  %p179_p4 = scmp.eq.s32.totalorder %s1612_s26, 1 }
   0x8   : > { %s2116_s30 = scalar_select %p160_p1, %s2036_s23, %s162_s28  }
   0x9   : > { %p2118_p5 = por %p173_p2, %p172_p0  ;;  %p2122_p6 = por %p179_p4, %p178_p3 }
   0xa   : > { %p1615_p7 = scmp.ge.s32.totalorder %s2040_s24, 1  ;;  %p227_p8 = scmp.lt.s32.totalorder %s2040_s24, 3 }
   0xc   : > { %p228_p9 = pnand %p1615_p7, %p227_p8 }
   0xd   : > { %s2128_s9 = sshll.u32 (!%p228_p9), %s1611_s25, 6  ;;  %v2134_v0 = vld [vmem:[%s2412_s3] sm:$0xff] (!%p228_p9)   ;;  %vm586_vm0 = vcmask (!%p228_p9), 130048   ;;  %v2042_v17 = vmov (!%p228_p9), 0   ;;  %v2239_v55 = vld [vmem:[%s2414_s5 + $0x10] sm:$0xff] (!%p228_p9)  ;;  %v1953_v60 = vld [vmem:[%s2412_s3 + $0x8] sm:$0xff] (!%p228_p9)  }
   0xe   : > { %231 = sbr.rel (%p228_p9) target bundleno = 684 (0x2ac), region = 44  ;;  %p263_p10 = scmp.lt.s32.totalorder (!%p228_p9), %s2128_s9, 127  ;;  %1729 = vmatprep.mubr.msk.bf16.mxu0 (!%p228_p9), %vm586_vm0, %v2134_v0  ;;  %1749 = vmatprep.mubr.msk.bf16.mxu1 (!%p228_p9), %vm586_vm0, %v2134_v0  ;;  %v2233_v54 = vld [vmem:[%s2414_s5] sm:$0xff] (!%p228_p9)  ;;  %v2256_v61 = vld [vmem:[%s2414_s5 + $0x8] sm:$0xff] (!%p228_p9)  ;;  %v2263_v63 = vld [vmem:[%s2414_s5 + $0x18] sm:$0xff] (!%p228_p9)  ;;  %vm1263_vm1 = vcmask (!%p228_p9), 261120  }
   0xf   : > { %1885 = vset.pattern.permute.xlu0 (!%p228_p9), %v2042_v17  ;;  %1886 = vset.pattern.permute.xlu1 (!%p228_p9), %v2042_v17  ;;  %s259_s28 = sand.u32 (!%p228_p9), 1, %s2032_s22   ;;  %s2367_s14 = scalar_lea.hbm (!%p228_p9), %s2415_s6, %s2128_s9 }
  0x10   : > { %1175 = vperm.xlu0 (!%p228_p9), %1885, %v2233_v54   ;;  %1185 = vperm.xlu1 (!%p228_p9), %1886, %v2239_v55   ;;  %s1616_s29 = sshll.u32 (!%p228_p9), %s259_s28, 2  ;;  %s1527_s15 = scalar_lea.sflag (!%p228_p9), [#allocation3], %s259_s28 }
  0x11   : > { %s261_s10 = scalar_lea.vmem (!%p228_p9), [#allocation2], %s1616_s29  ;;  %s2047_s17 = smov (!%p228_p9), [#allocation2]  }
  0x12   : > { %s1541_s11 = sshll.u32 (!%p228_p9), %s261_s10, 4  ;;  %s1982_s18 = sshll.u32 (!%p228_p9), %s2047_s17, 4  ;;  %s2369_s11 = int_to_ptr.vmem [resolvable:$true] %s1541_s11  ;;  %s1983_s18 = int_to_ptr.vmem [resolvable:$false] %s1982_s18 }
  0x13   : > { %p1985_p0 = scmp.lt.s32.totalorder (!%p228_p9), %s2369_s11, %s1983_s18 }
  0x14   : > { %1180 = vperm.xlu0 (!%p228_p9), %1885, %v2256_v61   ;;  %1190 = vperm.xlu1 (!%p228_p9), %1886, %v2263_v63  }
  0x15   : > { %s2137_s12 = scalar_select %p263_p10, %s2128_s9, 127 }
  0x17   : > { %s1618_s13 = sshll.u32 %s2137_s12, 2 }
  0x18   : > { %s2149_s16 = scalar_lea.vmem %s2410_s1, %s1618_s13  ;;  %s2194_s19 = scalar_lea.vmem %s2409_s0, %s1618_s13 }
  0x19   : > { %v1892_v1 = vld [vmem:[%s2149_s16 + $0x40] sm:$0xff]   ;;  %v1896_v6 = vld [vmem:[%s2149_s16 + $0x48] sm:$0xff]   ;;  %v1900_v12 = vld [vmem:[%s2149_s16 + $0x50] sm:$0xff]  }
  0x1a   : > { %v1893_v2 = vld [vmem:[%s2149_s16 + $0xc0] sm:$0xff]   ;;  %1809 = vmatprep.subr.msk.bf16.mxu0 %vm586_vm0, %v1892_v1  ;;  %v1897_v8 = vld [vmem:[%s2149_s16 + $0xc8] sm:$0xff]   ;;  %v1901_v14 = vld [vmem:[%s2149_s16 + $0xd0] sm:$0xff]  }
  0x1b   : > { %v1894_v3 = vld [vmem:[%s2149_s16] sm:$0xff]   ;;  %1817 = vmatprep.subr.msk.bf16.mxu1 %vm586_vm0, %v1893_v2  ;;  %v1898_v9 = vld [vmem:[%s2149_s16 + $0x8] sm:$0xff]   ;;  %v1902_v15 = vld [vmem:[%s2149_s16 + $0x10] sm:$0xff]  }
  0x1c   : > { %v1895_v4 = vld [vmem:[%s2149_s16 + $0x80] sm:$0xff]   ;;  %v594_v5 = vsel %vm586_vm0, %v1894_v3, 0  ;;  %v1899_v10 = vld [vmem:[%s2149_s16 + $0x88] sm:$0xff]   ;;  %v597_v11 = vsel %vm586_vm0, %v1898_v9, 0  ;;  %v1903_v16 = vld [vmem:[%s2149_s16 + $0x90] sm:$0xff]   ;;  %v600_v18 = vsel %vm586_vm0, %v1902_v15, 0 }
  0x1d   : > { %1714 = vmatpush3.bf16.xpose.msra.mxu0 %v594_v5  ;;  %v642_v7 = vsel %vm586_vm0, %v1895_v4, 0  ;;  %v645_v13 = vsel %vm586_vm0, %v1899_v10, 0  ;;  %v1904_v19 = vld [vmem:[%s2149_s16 + $0x58] sm:$0xff]   ;;  %v648_v20 = vsel %vm586_vm0, %v1903_v16, 0  ;;  %v1908_v25 = vld [vmem:[%s2149_s16 + $0x60] sm:$0xff]   ;;  %v1912_v31 = vld [vmem:[%s2149_s16 + $0x68] sm:$0xff]  }
  0x1e   : > { %1734 = vmatpush3.bf16.xpose.msra.mxu1 %v642_v7  ;;  %1810 = vmatprep.subr.msk.bf16.mxu0 %vm586_vm0, %v1896_v6  ;;  %v1905_v21 = vld [vmem:[%s2149_s16 + $0xd8] sm:$0xff]   ;;  %v1909_v27 = vld [vmem:[%s2149_s16 + $0xe0] sm:$0xff]   ;;  %v1913_v33 = vld [vmem:[%s2149_s16 + $0xe8] sm:$0xff]  }
  0x1f   : > { %1818 = vmatprep.subr.msk.bf16.mxu1 %vm586_vm0, %v1897_v8  ;;  %v1906_v22 = vld [vmem:[%s2149_s16 + $0x18] sm:$0xff]   ;;  %v1910_v28 = vld [vmem:[%s2149_s16 + $0x20] sm:$0xff]   ;;  %v1914_v34 = vld [vmem:[%s2149_s16 + $0x28] sm:$0xff]  }
  0x20   : > { %v1907_v23 = vld [vmem:[%s2149_s16 + $0x98] sm:$0xff]   ;;  %v603_v24 = vsel %vm586_vm0, %v1906_v22, 0  ;;  %v1911_v29 = vld [vmem:[%s2149_s16 + $0xa0] sm:$0xff]   ;;  %v606_v30 = vsel %vm586_vm0, %v1910_v28, 0  ;;  %v1915_v35 = vld [vmem:[%s2149_s16 + $0xa8] sm:$0xff]   ;;  %v609_v36 = vsel %vm586_vm0, %v1914_v34, 0 }
  0x21   : > { %v651_v26 = vsel %vm586_vm0, %v1907_v23, 0  ;;  %v654_v32 = vsel %vm586_vm0, %v1911_v29, 0  ;;  %v1916_v37 = vld [vmem:[%s2149_s16 + $0x70] sm:$0xff]   ;;  %v657_v38 = vsel %vm586_vm0, %v1915_v35, 0  ;;  %v1920_v43 = vld [vmem:[%s2149_s16 + $0x78] sm:$0xff]   ;;  %v1925_v49 = vld [vmem:[%s2194_s19 + $0x40] sm:$0xff]  }
  0x22   : > { %v1917_v39 = vld [vmem:[%s2149_s16 + $0xf0] sm:$0xff]   ;;  %v1921_v45 = vld [vmem:[%s2149_s16 + $0xf8] sm:$0xff]   ;;  %v1926_v51 = vld [vmem:[%s2194_s19 + $0xc0] sm:$0xff]  }
  0x23   : > { %v1918_v40 = vld [vmem:[%s2149_s16 + $0x30] sm:$0xff]   ;;  %v1922_v46 = vld [vmem:[%s2149_s16 + $0x38] sm:$0xff]   ;;  %v1927_v52 = vld [vmem:[%s2194_s19] sm:$0xff]  }
  0x24   : > { %v1919_v41 = vld [vmem:[%s2149_s16 + $0xb0] sm:$0xff]   ;;  %v612_v42 = vsel %vm586_vm0, %v1918_v40, 0  ;;  %v1923_v47 = vld [vmem:[%s2149_s16 + $0xb8] sm:$0xff]   ;;  %v615_v48 = vsel %vm586_vm0, %v1922_v46, 0  ;;  %v1928_v53 = vld [vmem:[%s2194_s19 + $0x80] sm:$0xff]   ;;  %v972_v56 = vsel %vm586_vm0, %v1927_v52, 0 }
  0x25   : > { %1716 = vmatpush3.bf16.xpose.msra.mxu0 %v597_v11  ;;  %v660_v44 = vsel %vm586_vm0, %v1919_v41, 0  ;;  %v663_v50 = vsel %vm586_vm0, %v1923_v47, 0  ;;  %v1929_v57 = vld [vmem:[%s2194_s19 + $0x48] sm:$0xff]   ;;  %v1020_v58 = vsel %vm586_vm0, %v1928_v53, 0  ;;  %v1933_v2 = vld [vmem:[%s2194_s19 + $0x50] sm:$0xff]   ;;  %v2278_v5 = vld [vmem:[%s2411_s2] sm:$0xff]  }
  0x26   : > { %1736 = vmatpush3.bf16.xpose.msra.mxu1 %v645_v13  ;;  %1811 = vmatprep.subr.msk.bf16.mxu0 %vm586_vm0, %v1900_v12  ;;  %v1930_v59 = vld [vmem:[%s2194_s19 + $0xc8] sm:$0xff]   ;;  %v1934_v4 = vld [vmem:[%s2194_s19 + $0xd0] sm:$0xff]   ;;  %v1937_v9 = vld [vmem:[%s2194_s19 + $0x58] sm:$0xff]   ;;  %s1978_s16 = scalar_lea.vmem %s2369_s11, 64 }
  0x27   : > { %1819 = vmatprep.subr.msk.bf16.mxu1 %vm586_vm0, %v1901_v14  ;;  %v1931_v62 = vld [vmem:[%s2194_s19 + $0x8] sm:$0xff]   ;;  %v1935_v6 = vld [vmem:[%s2194_s19 + $0x10] sm:$0xff]   ;;  %v1938_v11 = vld [vmem:[%s2194_s19 + $0xd8] sm:$0xff]   ;;  %p1979_p11 = scmp.ne.s32.totalorder %s2369_s11, %s1978_s16 }
  0x28   : > { %v975_v1 = vsel %vm586_vm0, %v1931_v62, 0  ;;  %v1936_v7 = vld [vmem:[%s2194_s19 + $0x90] sm:$0xff]   ;;  %v978_v8 = vsel %vm586_vm0, %v1935_v6, 0  ;;  %v1939_v12 = vld [vmem:[%s2194_s19 + $0x18] sm:$0xff]   ;;  %v1941_v15 = vld [vmem:[%s2194_s19 + $0x60] sm:$0xff]  }
  0x29   : > { %v1026_v10 = vsel %vm586_vm0, %v1936_v7, 0  ;;  %v1940_v13 = vld [vmem:[%s2194_s19 + $0x98] sm:$0xff]   ;;  %v981_v14 = vsel %vm586_vm0, %v1939_v12, 0  ;;  %v1945_v22 = vld [vmem:[%s2194_s19 + $0x68] sm:$0xff]   ;;  %v1949_v28 = vld [vmem:[%s2194_s19 + $0x70] sm:$0xff]   ;;  %p1980_p12 = pnand %p1979_p11, %p2118_p5 }
  0x2a   : > { %v1029_v16 = vsel %vm586_vm0, %v1940_v13, 0  ;;  %v1954_v34 = vld [vmem:[%s2194_s19 + $0x78] sm:$0xff]   ;;  %v1959_v41 = vld [vmem:[%s2411_s2 + $0x8] sm:$0xff]  }
  0x2b   : > { %p1981_p13 = pneg %p1980_p12 }
  0x2d   : > { %1718 = vmatpush3.bf16.xpose.msra.mxu0 %v600_v18  ;;  %v1942_v18 = vld [vmem:[%s2194_s19 + $0xe0] sm:$0xff]  }
  0x2e   : > { %1738 = vmatpush3.bf16.xpose.msra.mxu1 %v648_v20  ;;  %1812 = vmatprep.subr.msk.bf16.mxu0 %vm586_vm0, %v1904_v19  ;;  %v1943_v19 = vld [vmem:[%s2194_s19 + $0x20] sm:$0xff]  }
  0x2f   : > { %1820 = vmatprep.subr.msk.bf16.mxu1 %vm586_vm0, %v1905_v21  ;;  %v1944_v20 = vld [vmem:[%s2194_s19 + $0xa0] sm:$0xff]   ;;  %v984_v21 = vsel %vm586_vm0, %v1943_v19, 0 }
  0x30   : > { %v1032_v23 = vsel %vm586_vm0, %v1944_v20, 0 }
  0x35   : > { %1720 = vmatpush3.bf16.xpose.msra.mxu0 %v603_v24  ;;  %v1946_v24 = vld [vmem:[%s2194_s19 + $0xe8] sm:$0xff]  }
  0x36   : > { %1740 = vmatpush3.bf16.xpose.msra.mxu1 %v651_v26  ;;  %1813 = vmatprep.subr.msk.bf16.mxu0 %vm586_vm0, %v1908_v25  ;;  %v1947_v25 = vld [vmem:[%s2194_s19 + $0x28] sm:$0xff]  }
  0x37   : > { %1821 = vmatprep.subr.msk.bf16.mxu1 %vm586_vm0, %v1909_v27  ;;  %v1948_v26 = vld [vmem:[%s2194_s19 + $0xa8] sm:$0xff]   ;;  %v987_v27 = vsel %vm586_vm0, %v1947_v25, 0 }
  0x38   : > { %v1035_v29 = vsel %vm586_vm0, %v1948_v26, 0 }
  0x3d   : > { %1722 = vmatpush3.bf16.xpose.msra.mxu0 %v606_v30  ;;  %v1950_v30 = vld [vmem:[%s2194_s19 + $0xf0] sm:$0xff]  }
  0x3e   : > { %1742 = vmatpush3.bf16.xpose.msra.mxu1 %v654_v32  ;;  %1814 = vmatprep.subr.msk.bf16.mxu0 %vm586_vm0, %v1912_v31  ;;  %v1951_v31 = vld [vmem:[%s2194_s19 + $0x30] sm:$0xff]  }
  0x3f   : > { %1822 = vmatprep.subr.msk.bf16.mxu1 %vm586_vm0, %v1913_v33  ;;  %v1952_v32 = vld [vmem:[%s2194_s19 + $0xb0] sm:$0xff]   ;;  %v990_v33 = vsel %vm586_vm0, %v1951_v31, 0 }
  0x40   : > { %v1038_v35 = vsel %vm586_vm0, %v1952_v32, 0 }
  0x45   : > { %1724 = vmatpush3.bf16.xpose.msra.mxu0 %v609_v36  ;;  %v1955_v36 = vld [vmem:[%s2194_s19 + $0xf8] sm:$0xff]  }
  0x46   : > { %1744 = vmatpush3.bf16.xpose.msra.mxu1 %v657_v38  ;;  %1815 = vmatprep.subr.msk.bf16.mxu0 %vm586_vm0, %v1916_v37  ;;  %v1956_v37 = vld [vmem:[%s2194_s19 + $0x38] sm:$0xff]  }
  0x47   : > { %1823 = vmatprep.subr.msk.bf16.mxu1 %vm586_vm0, %v1917_v39  ;;  %v1957_v38 = vld [vmem:[%s2194_s19 + $0xb8] sm:$0xff]   ;;  %v993_v39 = vsel %vm586_vm0, %v1956_v37, 0 }
  0x48   : > { %v1041_v40 = vsel %vm586_vm0, %v1957_v38, 0 }
  0x4d   : > { %1726 = vmatpush3.bf16.xpose.msra.mxu0 %v612_v42  ;;  %v2043_v42 = vmov 1  }
  0x4e   : > { %1746 = vmatpush3.bf16.xpose.msra.mxu1 %v660_v44  ;;  %1816 = vmatprep.subr.msk.bf16.mxu0 %vm586_vm0, %v1920_v43  ;;  %v2044_v43 = vmov 2   ;;  %v2045_v44 = vmov 3  }
  0x4f   : > { %1824 = vmatprep.subr.msk.bf16.mxu1 %vm586_vm0, %v1921_v45  ;;  %1888 = vset.pattern.permute.xlu1 %v2043_v42 }
  0x50   : > { %1887 = vset.pattern.permute.xlu0 %v2043_v42  ;;  %1242 = vperm.xlu1 %1888, %v2256_v61   ;;  %v1960_v42 = vld [vmem:[%s2413_s4] sm:$0xff]  }
  0x51   : > { %1238 = vperm.xlu0 %1887, %v2233_v54  }
  0x54   : > { %1246 = vperm.xlu1 %1888, %v2239_v55  }
  0x55   : > { %1728 = vmatpush3.bf16.xpose.msra.mxu0 %v615_v48  ;;  %1250 = vperm.xlu0 %1887, %v2263_v63  }
  0x56   : > { %1748 = vmatpush3.bf16.xpose.msra.mxu1 %v663_v50  ;;  %1825 = vmatprep.subr.msk.bf16.mxu0 %vm586_vm0, %v1925_v49 }
  0x57   : > { %1833 = vmatprep.subr.msk.bf16.mxu1 %vm586_vm0, %v1926_v51 }
  0x58   : > { %1889 = vset.pattern.permute.xlu1 %v2044_v43 }
  0x59   : > { %1890 = vset.pattern.permute.xlu0 %v2044_v43  ;;  %1393 = vperm.xlu1 %1889, %v2233_v54   ;;  %v1961_v43 = vld [vmem:[%s2413_s4 + $0x8] sm:$0xff]  }
  0x5a   : > { %1397 = vperm.xlu0 %1890, %v2256_v61  }
  0x5c   : > { %1730 = vmatmul.mubr.msk.bf16.vlgmr.msra.gmra.mrb[0].mxu0 %vm586_vm0, %v2134_v0 }
  0x5d   : > { %1750 = vmatmul.mubr.msk.bf16.vlgmr.msra.gmra.mrb[0].mxu1 %vm586_vm0, %v2134_v0  ;;  %1754 = vmatpush3.bf16.xpose.msra.mxu0 %v972_v56  ;;  %v1932_v0 = vld [vmem:[%s2194_s19 + $0x88] sm:$0xff]   ;;  %s1984_s19 = scalar_lea.vmem %s1983_s18, 128 }
  0x5e   : > { %1774 = vmatpush3.bf16.xpose.msra.mxu1 %v1020_v58  ;;  %1826 = vmatprep.subr.msk.bf16.mxu0 %vm586_vm0, %v1929_v57  ;;  %v1023_v3 = vsel %vm586_vm0, %v1932_v0, 0  ;;  %p1986_p1 = scmp.lt.s32.totalorder %s1984_s19, %s1978_s16 }
  0x5f   : > { %1834 = vmatprep.subr.msk.bf16.mxu1 %vm586_vm0, %v1930_v59  ;;  %1731 = vmatprep.mubr.msk.bf16.mxu0 %vm586_vm0, %v1953_v60 }
  0x60   : > { %1751 = vmatprep.mubr.msk.bf16.mxu1 %vm586_vm0, %v1953_v60  ;;  %1401 = vperm.xlu1 %1889, %v2239_v55   ;;  %p1987_p2 = por %p1986_p1, %p1985_p0 }
  0x61   : > { %1891 = vset.pattern.permute.xlu0 %v2045_v44 }
  0x62   : > { %1461 = vperm.xlu0 %1891, %v2233_v54   ;;  %p1988_p3 = pnand %p1987_p2, %p1981_p13 }
  0x64   : > { %1732 = vmatmul.mubr.msk.bf16.gmra.mrb[4].mxu0 %vm586_vm0, %v1953_v60  ;;  %1405 = vperm.xlu1 %1889, %v2263_v63  }
  0x65   : > { %1756 = vmatpush3.bf16.xpose.msra.mxu0 %v975_v1  ;;  %1752 = vmatmul.mubr.msk.bf16.gmra.mrb[4].mxu1 %vm586_vm0, %v1953_v60 }
  0x66   : > { %1776 = vmatpush3.bf16.xpose.msra.mxu1 %v1023_v3  ;;  %1827 = vmatprep.subr.msk.bf16.mxu0 %vm586_vm0, %v1933_v2 }
  0x67   : > { %1835 = vmatprep.subr.msk.bf16.mxu1 %vm586_vm0, %v1934_v4  ;;  %1769 = vmatprep.mubr.msk.bf16.mxu0 %vm586_vm0, %v2278_v5 }
  0x68   : > { %1789 = vmatprep.mubr.msk.bf16.mxu1 %vm586_vm0, %v2278_v5 }
  0x6d   : > { %1758 = vmatpush3.bf16.xpose.msra.mxu0 %v978_v8 }
  0x6e   : > { %1778 = vmatpush3.bf16.xpose.msra.mxu1 %v1026_v10  ;;  %1828 = vmatprep.subr.msk.bf16.mxu0 %vm586_vm0, %v1937_v9 }
  0x6f   : > { %1836 = vmatprep.subr.msk.bf16.mxu1 %vm586_vm0, %v1938_v11 }
  0x75   : > { %1760 = vmatpush3.bf16.xpose.msra.mxu0 %v981_v14 }
  0x76   : > { %1780 = vmatpush3.bf16.xpose.msra.mxu1 %v1029_v16  ;;  %1829 = vmatprep.subr.msk.bf16.mxu0 %vm586_vm0, %v1941_v15 }
  0x77   : > { %1837 = vmatprep.subr.msk.bf16.mxu1 %vm586_vm0, %v1942_v18 }
  0x7d   : > { %1762 = vmatpush3.bf16.xpose.msra.mxu0 %v984_v21 }
  0x7e   : > { %1782 = vmatpush3.bf16.xpose.msra.mxu1 %v1032_v23  ;;  %1830 = vmatprep.subr.msk.bf16.mxu0 %vm586_vm0, %v1945_v22 }
  0x7f   : > { %1838 = vmatprep.subr.msk.bf16.mxu1 %vm586_vm0, %v1946_v24 }
  0x85   : > { %1764 = vmatpush3.bf16.xpose.msra.mxu0 %v987_v27 }
  0x86   : > { %1784 = vmatpush3.bf16.xpose.msra.mxu1 %v1035_v29  ;;  %1831 = vmatprep.subr.msk.bf16.mxu0 %vm586_vm0, %v1949_v28 }
  0x87   : > { %1839 = vmatprep.subr.msk.bf16.mxu1 %vm586_vm0, %v1950_v30 }
  0x8d   : > { %1766 = vmatpush3.bf16.xpose.msra.mxu0 %v990_v33 }
  0x8e   : > { %1786 = vmatpush3.bf16.xpose.msra.mxu1 %v1038_v35  ;;  %1832 = vmatprep.subr.msk.bf16.mxu0 %vm586_vm0, %v1954_v34 }
  0x8f   : > { %1840 = vmatprep.subr.msk.bf16.mxu1 %vm586_vm0, %v1955_v36  ;;  %v1176_v45 = vpop.permute.xlu0 %1175  ;;  %v1186_v48 = vpop.permute.xlu1 %1185 }
  0x93   : > { %v1181_v46 = vpop.permute.xlu0 %1180  ;;  %v1191_v11 = vpop.permute.xlu1 %1190 }
  0x95   : > { %1768 = vmatpush3.bf16.xpose.msra.mxu0 %v993_v39 }
  0x96   : > { %1788 = vmatpush3.bf16.xpose.msra.mxu1 %v1041_v40 }
  0x9c   : > { %1770 = vmatmul.mubr.msk.bf16.vlgmr.msra.gmra.mrb[0].mxu0 %vm586_vm0, %v2278_v5 }
  0x9d   : > { %1790 = vmatmul.mubr.msk.bf16.vlgmr.msra.gmra.mrb[0].mxu1 %vm586_vm0, %v2278_v5  ;;  %1771 = vmatprep.mubr.msk.bf16.mxu0 %vm586_vm0, %v1959_v41 }
  0x9e   : > { %1791 = vmatprep.mubr.msk.bf16.mxu1 %vm586_vm0, %v1959_v41 }
  0xa4   : > { %1772 = vmatmul.mubr.msk.bf16.gmra.mrb[4].mxu0 %vm586_vm0, %v1959_v41 }
  0xa5   : > { %1792 = vmatmul.mubr.msk.bf16.gmra.mrb[4].mxu1 %vm586_vm0, %v1959_v41  ;;  %1302 = vmatprep.mubr.bf16.mxu0 %v2042_v17 }
  0xa6   : > { %1355 = vmatprep.mubr.bf16.mxu1 %v2042_v17 }
  0xcf   : > { %v1243_v44 = vpop.permute.xlu1 %1242 }
 0x16f   : > { %v1101_v47 = vpop.f32.mrb[0].mxu0 }
 0x170   : > { %v1193_v49 = vadd.f32 %v1176_v45, %v1101_v47  ;;  %v1154_v50 = vpop.f32.mrb[0].mxu1  ;;  %v1103_v51 = vpop.f32.mrb[1].mxu0 }
 0x171   : > { %v1195_v52 = vadd.f32 %v1176_v45, %v1154_v50  ;;  %v1194_v53 = vadd.f32 %v1176_v45, %v1103_v51  ;;  %v1156_v56 = vpop.f32.mrb[1].mxu1  ;;  %v1105_v57 = vpop.f32.mrb[2].mxu0 }
 0x172   : > { %v1196_v58 = vadd.f32 %v1176_v45, %v1156_v56  ;;  %v1197_v59 = vadd.f32 %v1181_v46, %v1105_v57  ;;  %v1158_v55 = vpop.f32.mrb[2].mxu1  ;;  %v1107_v60 = vpop.f32.mrb[3].mxu0  ;;  %v1209_v0 = vmax.f32 %v1193_v49, 0.0 }
 0x173   : > { %v1199_v61 = vadd.f32 %v1181_v46, %v1158_v55  ;;  %v1198_v62 = vadd.f32 %v1181_v46, %v1107_v60  ;;  %v1160_v54 = vpop.f32.mrb[3].mxu1  ;;  %v1211_v2 = vmax.f32 %v1195_v52, 0.0  ;;  %v1210_v3 = vmax.f32 %v1194_v53, 0.0  ;;  %v1239_v45 = vpop.permute.xlu0 %1238 }
 0x174   : > { %v1213_v63 = vmax.f32 %v1197_v59, 0.0  ;;  %v1200_v1 = vadd.f32 %v1181_v46, %v1160_v54  ;;  %v1212_v6 = vmax.f32 %v1196_v58, 0.0  ;;  %v1247_v46 = vpop.permute.xlu1 %1246 }
 0x175   : > { %v1215_v4 = vmax.f32 %v1199_v61, 0.0  ;;  %v1214_v5 = vmax.f32 %v1198_v62, 0.0 }
 0x176   : > { %v1229_v7 = vpack.c.bf16 %v1213_v63, %v1209_v0  ;;  %v1216_v8 = vmax.f32 %v1200_v1, 0.0 }
 0x177   : > { %v1231_v9 = vpack.c.bf16 %v1215_v4, %v1211_v2  ;;  %v1230_v10 = vpack.c.bf16 %v1214_v5, %v1210_v3  ;;  %v1111_v12 = vpop.f32.mrb[4].mxu0  ;;  %v1251_v47 = vpop.permute.xlu0 %1250 }
 0x178   : > { %v1232_v13 = vpack.c.bf16 %v1216_v8, %v1212_v6  ;;  %v1201_v14 = vadd.f32 %v1186_v48, %v1111_v12  ;;  %v1164_v15 = vpop.f32.mrb[4].mxu1  ;;  %v1113_v16 = vpop.f32.mrb[5].mxu0 }
 0x179   : > { %v1203_v18 = vadd.f32 %v1186_v48, %v1164_v15  ;;  %v1202_v19 = vadd.f32 %v1186_v48, %v1113_v16  ;;  %v1166_v20 = vpop.f32.mrb[5].mxu1  ;;  %v1115_v21 = vpop.f32.mrb[6].mxu0  ;;  %1270 = vmatprep.subr.bf16.mxu0 %v1230_v10 }
 0x17a   : > { %v1204_v22 = vadd.f32 %v1186_v48, %v1166_v20  ;;  %v1205_v23 = vadd.f32 %v1191_v11, %v1115_v21  ;;  %v1168_v24 = vpop.f32.mrb[6].mxu1  ;;  %1323 = vmatprep.subr.bf16.mxu1 %v1232_v13  ;;  %v1117_v25 = vpop.f32.mrb[7].mxu0  ;;  %1271 = vmatpush1.bf16.msra.mxu0 %v1229_v7  ;;  %v1217_v29 = vmax.f32 %v1201_v14, 0.0 }
 0x17b   : > { %v1207_v26 = vadd.f32 %v1191_v11, %v1168_v24  ;;  %v1206_v27 = vadd.f32 %v1191_v11, %v1117_v25  ;;  %v1170_v28 = vpop.f32.mrb[7].mxu1  ;;  %1324 = vmatpush1.bf16.msra.mxu1 %v1231_v9  ;;  %v1219_v32 = vmax.f32 %v1203_v18, 0.0  ;;  %v1218_v33 = vmax.f32 %v1202_v19, 0.0  ;;  %v1394_v49 = vpop.permute.xlu1 %1393 }
 0x17c   : > { %v1221_v30 = vmax.f32 %v1205_v23, 0.0  ;;  %v1208_v31 = vadd.f32 %v1191_v11, %v1170_v28  ;;  %v1220_v36 = vmax.f32 %v1204_v22, 0.0  ;;  %v1398_v2 = vpop.permute.xlu0 %1397 }
 0x17d   : > { %v1223_v34 = vmax.f32 %v1207_v26, 0.0  ;;  %v1222_v35 = vmax.f32 %v1206_v27, 0.0 }
 0x17e   : > { %v1233_v37 = vpack.c.bf16 %v1221_v30, %v1217_v29  ;;  %v1224_v38 = vmax.f32 %v1208_v31, 0.0 }
 0x17f   : > { %v1235_v39 = vpack.c.bf16 %v1223_v34, %v1219_v32  ;;  %v1234_v40 = vpack.c.bf16 %v1222_v35, %v1218_v33  ;;  %v1402_v15 = vpop.permute.xlu1 %1401 }
 0x180   : > { %v1236_v41 = vpack.c.bf16 %v1224_v38, %v1220_v36 }
 0x181   : > { %1272 = vmatprep.subr.bf16.mxu0 %v1234_v40 }
 0x182   : > { %1325 = vmatprep.subr.bf16.mxu1 %v1236_v41  ;;  %1273 = vmatpush1.bf16.msra.mxu0 %v1233_v37 }
 0x183   : > { %1326 = vmatpush1.bf16.msra.mxu1 %v1235_v39 }
 0x185   : > { %1699 = vmatmul.mubr.msk.bf16.vlgmr.msra.gmra.mrb[8].mxu0 %vm1263_vm1, %v1960_v42 }
 0x186   : > { %1701 = vmatmul.mubr.msk.bf16.vlgmr.msra.gmra.mrb[8].mxu1 %vm1263_vm1, %v1960_v42  ;;  %1312 = vmatprep.mubr.bf16.mxu0 %v2042_v17 }
 0x187   : > { %1365 = vmatprep.mubr.bf16.mxu1 %v2042_v17 }
 0x18d   : > { %1700 = vmatmul.mubr.msk.bf16.gmra.mrb[12].mxu0 %vm1263_vm1, %v1961_v43 }
 0x18e   : > { %1702 = vmatmul.mubr.msk.bf16.gmra.mrb[12].mxu1 %vm1263_vm1, %v1961_v43 }
 0x258   : > { %v1304_v48 = vpop.f32.mrb[8].mxu0 }
 0x259   : > { %v1305_v50 = vadd.f32 %v1304_v48, %v1239_v45  ;;  %v1357_v51 = vpop.f32.mrb[8].mxu1  ;;  %v1306_v52 = vpop.f32.mrb[9].mxu0 }
 0x25a   : > { %v1358_v53 = vadd.f32 %v1357_v51, %v1239_v45  ;;  %v1307_v56 = vadd.f32 %v1306_v52, %v1239_v45  ;;  %v1359_v57 = vpop.f32.mrb[9].mxu1  ;;  %v1308_v58 = vpop.f32.mrb[10].mxu0 }
 0x25b   : > { %v1376_v17 = vmax.f32 %v1305_v50, 0.0  ;;  %v1360_v59 = vadd.f32 %v1359_v57, %v1239_v45  ;;  %v1309_v55 = vadd.f32 %v1308_v58, %v1243_v44  ;;  %v1361_v60 = vpop.f32.mrb[10].mxu1  ;;  %v1310_v61 = vpop.f32.mrb[11].mxu0 }
 0x25c   : > { %v1378_v62 = vmax.f32 %v1358_v53, 0.0  ;;  %v1377_v54 = vmax.f32 %v1307_v56, 0.0  ;;  %v1362_v0 = vadd.f32 %v1361_v60, %v1243_v44  ;;  %v1311_v63 = vadd.f32 %v1310_v61, %v1243_v44  ;;  %v1363_v1 = vpop.f32.mrb[11].mxu1  ;;  %v1406_v51 = vpop.permute.xlu1 %1405 }
 0x25d   : > { %v1379_v3 = vmax.f32 %v1360_v59, 0.0  ;;  %v1380_v4 = vmax.f32 %v1309_v55, 0.0  ;;  %v1364_v5 = vadd.f32 %v1363_v1, %v1243_v44  ;;  %v1408_v9 = vmul.f32 %v1394_v49, %v1376_v17 }
 0x25e   : > { %v1382_v6 = vmax.f32 %v1362_v0, 0.0  ;;  %v1381_v7 = vmax.f32 %v1311_v63, 0.0  ;;  %v1409_v11 = vmul.f32 %v1394_v49, %v1377_v54  ;;  %v1410_v12 = vmul.f32 %v1394_v49, %v1378_v62 }
 0x25f   : > { %v1383_v8 = vmax.f32 %v1364_v5, 0.0  ;;  %v1412_v10 = vmul.f32 %v1398_v2, %v1380_v4  ;;  %v1411_v18 = vmul.f32 %v1394_v49, %v1379_v3 }
 0x260   : > { %v1413_v13 = vmul.f32 %v1398_v2, %v1381_v7  ;;  %v1414_v14 = vmul.f32 %v1398_v2, %v1382_v6  ;;  %v1314_v16 = vpop.f32.mrb[12].mxu0 }
 0x261   : > { %v1415_v19 = vmul.f32 %v1398_v2, %v1383_v8  ;;  %v1315_v20 = vadd.f32 %v1314_v16, %v1247_v46  ;;  %v1424_v21 = vadd.f32 %v1412_v10, %v1408_v9  ;;  %v1367_v22 = vpop.f32.mrb[12].mxu1  ;;  %v1316_v23 = vpop.f32.mrb[13].mxu0 }
 0x262   : > { %v1368_v24 = vadd.f32 %v1367_v22, %v1247_v46  ;;  %v1442_v25 = vadd.f32 %v1414_v14, %v1410_v12  ;;  %v1317_v26 = vadd.f32 %v1316_v23, %v1247_v46  ;;  %v1433_v27 = vadd.f32 %v1413_v13, %v1409_v11  ;;  %v1369_v28 = vpop.f32.mrb[13].mxu1  ;;  %v1318_v29 = vpop.f32.mrb[14].mxu0 }
 0x263   : > { %v1384_v30 = vmax.f32 %v1315_v20, 0.0  ;;  %v1370_v31 = vadd.f32 %v1369_v28, %v1247_v46  ;;  %v1451_v32 = vadd.f32 %v1415_v19, %v1411_v18  ;;  %v1319_v33 = vadd.f32 %v1318_v29, %v1251_v47  ;;  %v1371_v34 = vpop.f32.mrb[14].mxu1  ;;  %v1320_v35 = vpop.f32.mrb[15].mxu0 }
 0x264   : > { %v1386_v36 = vmax.f32 %v1368_v24, 0.0  ;;  %v1385_v37 = vmax.f32 %v1317_v26, 0.0  ;;  %v1372_v38 = vadd.f32 %v1371_v34, %v1251_v47  ;;  %v1321_v39 = vadd.f32 %v1320_v35, %v1251_v47  ;;  %v1373_v40 = vpop.f32.mrb[15].mxu1  ;;  %v1462_v16 = vpop.permute.xlu0 %1461 }
 0x265   : > { %v1416_v41 = vmul.f32 %v1402_v15, %v1384_v30  ;;  %v1387_v42 = vmax.f32 %v1370_v31, 0.0  ;;  %v1388_v43 = vmax.f32 %v1319_v33, 0.0  ;;  %v1374_v44 = vadd.f32 %v1373_v40, %v1251_v47 }
 0x266   : > { %v1418_v45 = vmul.f32 %v1402_v15, %v1386_v36  ;;  %v1417_v48 = vmul.f32 %v1402_v15, %v1385_v37  ;;  %v1390_v49 = vmax.f32 %v1372_v38, 0.0  ;;  %v1389_v50 = vmax.f32 %v1321_v39, 0.0 }
 0x267   : > { %v1425_v52 = vadd.f32 %v1424_v21, %v1416_v41  ;;  %v1419_v46 = vmul.f32 %v1402_v15, %v1387_v42  ;;  %v1391_v53 = vmax.f32 %v1374_v44, 0.0  ;;  %v1420_v56 = vmul.f32 %v1406_v51, %v1388_v43 }
 0x268   : > { %v1443_v57 = vadd.f32 %v1442_v25, %v1418_v45  ;;  %v1434_v58 = vadd.f32 %v1433_v27, %v1417_v48  ;;  %v1421_v17 = vmul.f32 %v1406_v51, %v1389_v50  ;;  %v1422_v59 = vmul.f32 %v1406_v51, %v1390_v49 }
 0x269   : > { %v1452_v55 = vadd.f32 %v1451_v32, %v1419_v46  ;;  %v1423_v60 = vmul.f32 %v1406_v51, %v1391_v53  ;;  %v1426_v61 = vadd.f32 %v1425_v52, %v1420_v56  ;;  %v2046_v41 = vmov 1966171168  }
 0x26a   : > { %v1435_v62 = vadd.f32 %v1434_v58, %v1421_v17  ;;  %v1444_v54 = vadd.f32 %v1443_v57, %v1422_v59  ;;  %v1499_v42 = vunpack.c.l.s4 %v2046_v41  ;;  %v1501_v43 = vlaneseq }
 0x26b   : > { %v1427_v0 = vrot.slane %v1426_v61, 4  ;;  %v1453_v47 = vadd.f32 %v1452_v55, %v1423_v60 }
 0x26c   : > { %v1436_v63 = vrot.slane %v1435_v62, 4  ;;  %v1445_v1 = vrot.slane %v1444_v54, 4  ;;  %v1500_v44 = vunpack.c.0.s8 %v1499_v42  ;;  %v1502_v45 = vshrl.u32 %v1501_v43, 7 }
 0x26d   : > { %v1428_v2 = vadd.f32 %v1427_v0, %v1426_v61  ;;  %v1454_v3 = vrot.slane %v1453_v47, 4  ;;  %vm1523_vm2 = vcmp.lt.s32.totalorder %v1501_v43, 512 }
 0x26e   : > { %v1437_v4 = vadd.f32 %v1436_v63, %v1435_v62  ;;  %v1446_v5 = vadd.f32 %v1445_v1, %v1444_v54  ;;  %v1503_v49 = vsub.s32 %v1500_v44, %v1502_v45 }
 0x26f   : > { %v1455_v6 = vadd.f32 %v1454_v3, %v1453_v47  ;;  %v1429_v7 = vrot.slane %v1428_v2, 2 }
 0x270   : > { %v1438_v8 = vrot.slane %v1437_v4, 2  ;;  %v1447_v9 = vrot.slane %v1446_v5, 2 }
 0x271   : > { %v1430_v10 = vadd.f32 %v1429_v7, %v1428_v2  ;;  %v1456_v11 = vrot.slane %v1455_v6, 2 }
 0x272   : > { %v1439_v12 = vadd.f32 %v1438_v8, %v1437_v4  ;;  %v1448_v13 = vadd.f32 %v1447_v9, %v1446_v5 }
 0x273   : > { %v1431_v14 = vrot.slane %v1430_v10, 1  ;;  %v1457_v15 = vadd.f32 %v1456_v11, %v1455_v6 }
 0x274   : > { %v1440_v18 = vrot.slane %v1439_v12, 1  ;;  %v1449_v19 = vrot.slane %v1448_v13, 1 }
 0x275   : > { %v1432_v20 = vadd.f32 %v1431_v14, %v1430_v10  ;;  %v1458_v21 = vrot.slane %v1457_v15, 1 }
 0x276   : > { %v1441_v22 = vadd.f32 %v1440_v18, %v1439_v12  ;;  %v1450_v23 = vadd.f32 %v1449_v19, %v1448_v13 }
 0x277   : > { %v1459_v24 = vadd.f32 %v1458_v21, %v1457_v15  ;;  %v1464_v25 = vadd.f32 %v1462_v16, %v1432_v20 }
 0x278   : > { %v1465_v26 = vadd.f32 %v1462_v16, %v1441_v22  ;;  %v1466_v27 = vadd.f32 %v1462_v16, %v1450_v23 }
 0x279   : > { %v1467_v28 = vadd.f32 %v1462_v16, %v1459_v24  ;;  %v1703_v29 = vmul.f32 -1.442695, %v1464_v25 }
 0x27a   : > { %v1704_v30 = vmul.f32 -1.442695, %v1465_v26  ;;  %v1705_v31 = vmul.f32 -1.442695, %v1466_v27 }
 0x27b   : > { %1962 = vpow2.f32 %v1703_v29  ;;  %v1706_v32 = vmul.f32 -1.442695, %v1467_v28 }
 0x27c   : > { %1964 = vpow2.f32 %v1704_v30 }
 0x27d   : > { %1966 = vpow2.f32 %v1705_v31 }
 0x27e   : > { %1968 = vpow2.f32 %v1706_v32 }
 0x285   : > { %v1963_v33 = vpop.eup %1962 }
 0x286   : > { %v1965_v34 = vpop.eup %1964  ;;  %v1480_v35 = vadd.f32 1.0, %v1963_v33 }
 0x287   : > { %v1967_v36 = vpop.eup %1966  ;;  %v1481_v37 = vadd.f32 1.0, %v1965_v34 }
 0x288   : > { %v1969_v38 = vpop.eup %1968  ;;  %v1482_v39 = vadd.f32 1.0, %v1967_v36  ;;  %1970 = vrcp.f32 %v1480_v35 }
 0x289   : > { %v1483_v40 = vadd.f32 1.0, %v1969_v38  ;;  %1972 = vrcp.f32 %v1481_v37 }
 0x28a   : > { %1974 = vrcp.f32 %v1482_v39 }
 0x28b   : > { %1976 = vrcp.f32 %v1483_v40 }
 0x292   : > { %v1971_v48 = vpop.eup %1970 }
 0x293   : > { %v1973_v50 = vpop.eup %1972 }
 0x294   : > { %v1975_v51 = vpop.eup %1974  ;;  %v1496_v52 = vcombine.low %v1971_v48, %v1973_v50 }
 0x295   : > { %v1977_v46 = vpop.eup %1976 }
 0x296   : > { %v1497_v53 = vcombine.low %v1975_v51, %v1977_v46  ;;  %v1504_v56 = vrot.slane %v1496_v52, %v1503_v49 }
 0x298   : > { %v1511_v57 = vrot.slane %v1497_v53, %v1503_v49 }
 0x29a   : > { %v1512_v58 = vcombine.low %v1504_v56, %v1511_v57 }
 0x29c   : > { %v1519_v17 = vrot.slane %v1512_v58, %v1503_v49 }
 0x29e   : > { %1525 = vst.msk [vmem:[%s261_s10] sm:$0xf] %vm1523_vm2, %v1519_v17 }
 0x29f   : > { %1991 = shalt.err (!%p1988_p3)
}
 0x2a0   : > { %s1992_s9 = scalar_lea.hbm %s2367_s14, 64  ;;  %s1996_s26 = scalar_lea.hbm %s2415_s6, 128 }
 0x2a1   : > { %p1993_p4 = scmp.ne.s32.totalorder %s2367_s14, %s1992_s9  ;;  %p1997_p9 = scmp.lt.u32.totalorder %s2367_s14, %s2415_s6 }
 0x2a2   : > { %p1998_p10 = scmp.lt.u32.totalorder %s1996_s26, %s1992_s9  ;;  %p2000_p12 = scmp.lt.u32.totalorder %s1992_s9, %s2367_s14 }
 0x2a3   : > { %p1994_p7 = pnand %p1993_p4, %p2118_p5 }
 0x2a4   : > { %p1999_p11 = por %p1998_p10, %p1997_p9 }
 0x2a5   : > { %p1995_p8 = pneg %p1994_p7 }
 0x2a6   : > { %p2001_p13 = por %p2000_p12, %p1999_p11 }
 0x2a8   : > { %p2002_p0 = pnand %p2001_p13, %p1995_p8 }
 0x2aa   : > { %2005 = shalt.err (!%p2002_p0)
}
 0x2ab   : > { %1841 = dma.vmem_to_hbm [thread:$0]  (%p2118_p5), %s2369_s11, 64, %s2367_s14, %s1527_s15  }
 0x2ac PF: > { %p1847_p1 = scmp.ge.s32.totalorder %s2040_s24, 2  ;;  %s1553_s10 = sand.u32 1, %s2028_s21  }
 0x2ad   : > { %s1554_s12 = scalar_lea.sflag [#allocation3], %s1553_s10 }
 0x2ae   : > { %p1844_p2 = pnand %p1847_p1, %p2122_p6 }
 0x2b0   : > { %2023 = dma.done.wait (!%p1844_p2), %s1554_s12, 64  }
 0x2b1   : > { %2025 = vsyncadd (!%p1844_p2), %s1554_s12, 4294967232  ;;  %p16_p3 = scmp.ge.s32.totalorder %s2106_s27, 4   ;;  %s2418_s21 = smov %s2032_s22 }
 0x2b2   : > { %s2419_s22 = smov %s2036_s23  ;;  %s2420_s23 = smov %s2116_s30 }
 0x2b3   : > { %s2421_s24 = smov %s2106_s27  ;;  %18 = sbr.rel (!%p16_p3) target bundleno = 3 (0x3), region = 82 }
 0x2ba   :  { %1559 = vsyncpa [#allocation3], 1 }
 0x2bb   :  { %1561 = vsyncpa [#allocation3 + $0x1], 1 }

</bundles_post_ra>
